<compile_context>
chip_gen: v7x
topology: tpu7x:2x2x1
jax: 0.10.0
libtpu: 0.0.40
codegen_flags: <defaults>
</compile_context>

<pallas_src>
import functools

import numpy as np
import jax
import jax.numpy as jnp
from jax.experimental import pallas as pl
from jax.experimental.pallas import tpu as pltpu

# ----------------------------- configuration ------------------------------
OBS_DIM = 16           # preprocess net input dim
STATE_DIM = 32         # preprocess net output_dim (= self.state_dim)
HYPER_EMBED = 32       # self.hypernet_embed_dim (fixed to 32 in the module)
SAMPLE_SIZE = 8        # self.sample_size
OUTPUT_DIM = 4         # np.prod(action_shape), action_shape=(4,)
BATCH = 2

HS = HYPER_EMBED * SAMPLE_SIZE                 # 256  (hyper_w_1 flat width)
OS = OUTPUT_DIM * SAMPLE_SIZE                  # 32   (output_dim * sample_size)
HOS = HYPER_EMBED * OS                         # 1024 (hyper_w_final flat width)
HEAD_W = 3 * HYPER_EMBED + OS                  # 128  (fused hypernet heads)

# fused bf16 weight slab column layout: [ w_head | w1b | wfb ]
WHEAD_OFF = 0
W1B_OFF = HEAD_W                               # 128
WFB_OFF = HEAD_W + HS                          # 384
W_SLAB_W = HEAD_W + HS + HOS                   # 1408

# f32 bias slab column layout, each segment 128-lane aligned
def _round_up(x, m):
    return ((x + m - 1) // m) * m

BP_OFF = 0
BHEAD_OFF = _round_up(STATE_DIM, 128)          # 128
B1B_OFF = BHEAD_OFF + _round_up(HEAD_W, 128)   # 256
BFB_OFF = B1B_OFF + _round_up(HS, 128)         # 512
B_SLAB_W = BFB_OFF + _round_up(HOS, 128)       # 1536

OUT_W = 128                                    # lane-dense packed output width


# ------------------------------ Pallas kernel -----------------------------
def monotone_iqn_kernel(obs_ref, taus_ref, wp_ref, e1_ref, g1_ref,
                        w_ref, b_ref, out_ref):
    f32 = jnp.float32
    bf16 = jnp.bfloat16
    H = HYPER_EMBED
    TB = out_ref.shape[0]

    obs = obs_ref[...]                                   # (TB, OBS_DIM) f32
    taus = taus_ref[...]                                 # (TB, S)       f32

    # f32 bias views (each segment 128-lane aligned inside the slab)
    bp = b_ref[:, BP_OFF:BP_OFF + STATE_DIM]             # (1, 32)
    b_head = b_ref[:, BHEAD_OFF:BHEAD_OFF + HEAD_W]      # (1, 128)
    b1b = b_ref[:, B1B_OFF:B1B_OFF + HS]                 # (1, 256)
    bfb = b_ref[:, BFB_OFF:BFB_OFF + HOS]                # (1, 1024)

    # ---- preprocess net (fused): Linear + ReLU -> logits (TB, STATE_DIM) --
    logits = jnp.maximum(
        jnp.dot(obs.astype(bf16), wp_ref[...],
                preferred_element_type=f32) + bp, 0.0)

    # ---- fused hypernet heads: one lane-dense (TB, 128) bf16 matmul -------
    # columns: [ hyper_w_1.lin0 | hyper_b_1 | hyper_w_final.lin0 | hyper_b_final ]
    heads = jnp.dot(logits.astype(bf16), w_ref[:, WHEAD_OFF:WHEAD_OFF + HEAD_W],
                    preferred_element_type=f32) + b_head
    h1 = jnp.maximum(heads[:, 0:H], 0.0)                 # ReLU of hyper_w_1 lin0
    b1 = heads[:, H:2 * H]                               # hyper_b_1(logits)
    hf = jnp.maximum(heads[:, 2 * H:3 * H], 0.0)         # ReLU of hyper_w_final lin0
    b_final = heads[:, 3 * H:3 * H + OS]                 # hyper_b_final(logits)

    # ---- hyper_w_1 second layer, then abs: (TB, H*S) ----------------------
    w1_flat = jnp.abs(
        jnp.dot(h1.astype(bf16), w_ref[:, W1B_OFF:W1B_OFF + HS],
                preferred_element_type=f32) + b1b)

    # ---- x = bmm(taus(B,1,S), w1(B,S,H)) + b1 via MXU selectors E1/G1 -----
    # tau_exp[b, m] = taus[b, m // H];  x[b, h] = sum_{m % H == h} prod[b, m]
    tau_exp = jnp.dot(taus.astype(bf16), e1_ref[...],
                      preferred_element_type=f32)        # (TB, H*S)
    x = jnp.dot((tau_exp * w1_flat).astype(bf16), g1_ref[...],
                preferred_element_type=f32) + b1         # (TB, H)
    hidden = jnp.maximum(x, 0.0)

    # ---- hyper_w_final second layer, then abs: (TB, H*O*S) ----------------
    wf_flat = jnp.abs(
        jnp.dot(hf.astype(bf16), w_ref[:, WFB_OFF:WFB_OFF + HOS],
                preferred_element_type=f32) + bfb)

    # ---- y = bmm(hidden(B,1,H), wf(B,H,O*S)) + b_final --------------------
    # 32-term unrolled f32 VPU reduction (replaces the E2/G2 selector matmuls)
    y = b_final
    for j in range(H):
        y = y + hidden[:, j:j + 1] * wf_flat[:, j * OS:(j + 1) * OS]

    # ---- lane-dense 128-wide packed output: [ y | hidden | zero pad ] -----
    out_ref[:, 0:OS] = y
    out_ref[:, OS:OS + H] = hidden
    if OUT_W > OS + H:
        out_ref[:, OS + H:] = jnp.zeros((TB, OUT_W - OS - H), f32)


# --------------------- host-side parameter preparation ----------------------
def prepare_params(params):
    """Build the fused bf16 weight slab, f32 bias slab and selector constants.

    Call ONCE per model and reuse across forward calls (no per-call concat).
    """
    bf16 = jnp.bfloat16
    f32 = jnp.float32

    # fused hypernet heads (shared LHS = logits)
    w_head = jnp.concatenate(
        [params["w1a"], params["wb1"], params["wfa"], params["wbf"]], axis=1)
    b_head = jnp.concatenate(
        [params["b1a"], params["bb1"], params["bfa"], params["bbf"]], axis=1)

    # bf16 weight slab: [ w_head | w1b | wfb ]  -> (STATE_DIM, 1408)
    w_slab = jnp.concatenate(
        [w_head, params["w1b"], params["wfb"]], axis=1).astype(bf16)

    # f32 bias slab with 128-lane-aligned segments -> (1, 1536)
    def pad_lanes(b, width):
        b = b.astype(f32)
        return jnp.pad(b, ((0, 0), (0, width - b.shape[1])))

    b_slab = jnp.concatenate([
        pad_lanes(params["bp"], BHEAD_OFF - BP_OFF),
        pad_lanes(b_head, B1B_OFF - BHEAD_OFF),
        pad_lanes(params["b1b"], BFB_OFF - B1B_OFF),
        pad_lanes(params["bfb"], B_SLAB_W - BFB_OFF),
    ], axis=1)

    # selector constants for the first (small) bmm — exact in bf16 (0/1)
    H, S = HYPER_EMBED, SAMPLE_SIZE
    E1 = (np.arange(HS)[None, :] // H == np.arange(S)[:, None]).astype(np.float32)
    G1 = (np.arange(HS)[:, None] % H == np.arange(H)[None, :]).astype(np.float32)

    return dict(
        wp=params["wp"].astype(bf16),
        e1=jnp.asarray(E1, bf16),
        g1=jnp.asarray(G1, bf16),
        w_slab=w_slab,
        b_slab=b_slab,
    )


# ------------------------------ JAX wrapper --------------------------------
@functools.partial(jax.jit, static_argnames=("tile_b",))
def monotone_iqn_forward(obs, taus, prepared, *, tile_b=256):
    """Pallas implementation of MonotoneIQN.forward (preprocess fused in-kernel).

    Returns ((out, taus), hidden) matching the PyTorch module:
      out    : (B, output_dim, sample_size)
      taus   : (B, 1, sample_size)
      hidden : (B, 1, hypernet_embed_dim)
    """
    B = obs.shape[0]
    H, S, O = HYPER_EMBED, SAMPLE_SIZE, OUTPUT_DIM

    # sublane-aligned batch tile; pad batch up to a multiple of the tile
    tb = min(tile_b, _round_up(B, 8))
    b_pad = _round_up(B, tb)
    if b_pad != B:
        obs_p = jnp.pad(obs, ((0, b_pad - B), (0, 0)))
        taus_p = jnp.pad(taus, ((0, b_pad - B), (0, 0)))
    else:
        obs_p, taus_p = obs, taus
    grid = (b_pad // tb,)

    batched = lambda shape: pl.BlockSpec(shape, lambda i: (i, 0))
    const = lambda shape: pl.BlockSpec(shape, lambda i: (0, 0))

    # advisory cost estimate for XLA's scheduler
    flops = 2 * b_pad * (OBS_DIM * STATE_DIM + STATE_DIM * HEAD_W + H * HS
                         + H * HOS + S * HS + HS * H + H * OS)
    bytes_accessed = (b_pad * (OBS_DIM + S + OUT_W) * 4
                      + OBS_DIM * STATE_DIM * 2 + STATE_DIM * W_SLAB_W * 2
                      + B_SLAB_W * 4 + S * HS * 2 + HS * H * 2)

    packed = pl.pallas_call(
        monotone_iqn_kernel,
        out_shape=jax.ShapeDtypeStruct((b_pad, OUT_W), jnp.float32),
        grid=grid,
        in_specs=[
            batched((tb, OBS_DIM)),          # obs      (batch-tiled)
            batched((tb, S)),                # taus     (batch-tiled)
            const((OBS_DIM, STATE_DIM)),     # wp       (VMEM-resident)
            const((S, HS)),                  # E1
            const((HS, H)),                  # G1
            const((STATE_DIM, W_SLAB_W)),    # bf16 weight slab
            const((1, B_SLAB_W)),            # f32 bias slab
        ],
        out_specs=batched((tb, OUT_W)),
        compiler_params=pltpu.CompilerParams(
            dimension_semantics=("parallel",)),
        cost_estimate=pl.CostEstimate(
            flops=flops, transcendentals=0, bytes_accessed=bytes_accessed),
    )(obs_p, taus_p, prepared["wp"], prepared["e1"], prepared["g1"],
      prepared["w_slab"], prepared["b_slab"])

    y = packed[:B, :OS]
    hidden = packed[:B, OS:OS + H]
    out = y.reshape(B, O, S)          # matches torch .view(B, output_dim, sample_size)
    taus_out = taus.reshape(B, 1, S)  # matches torch taus.view(-1, 1, sample_size)
    hidden_out = hidden.reshape(B, 1, H)
    return (out, taus_out), hidden_out


# --------------------------- reference (plain JAX) --------------------------
def monotone_iqn_reference(obs, taus, params):
    B = obs.shape[0]
    H, S, O = HYPER_EMBED, SAMPLE_SIZE, OUTPUT_DIM
    logits = jax.nn.relu(obs @ params["wp"] + params["bp"])
    h1 = jax.nn.relu(logits @ params["w1a"] + params["b1a"])
    w1 = jnp.abs(h1 @ params["w1b"] + params["b1b"]).reshape(B, S, H)
    b1 = (logits @ params["wb1"] + params["bb1"]).reshape(B, 1, H)
    t = taus.reshape(B, 1, S)
    x = jnp.einsum("bis,bsh->bih", t, w1) + b1
    hidden = jax.nn.relu(x)                                   # (B, 1, H)
    hf = jax.nn.relu(logits @ params["wfa"] + params["bfa"])
    wf = jnp.abs(hf @ params["wfb"] + params["bfb"]).reshape(B, H, O * S)
    bf = (logits @ params["wbf"] + params["bbf"]).reshape(B, 1, O * S)
    y = jnp.einsum("bih,bhn->bin", hidden, wf) + bf
    out = y.reshape(B, O, S)
    return (out, t), hidden


# ------------------------------ param init ---------------------------------
def init_params(key):
    def lin(key, fan_in, fan_out, scale=0.1):
        kw, kb = jax.random.split(key)
        w = jax.random.normal(kw, (fan_in, fan_out), jnp.float32) * scale
        b = jax.random.normal(kb, (1, fan_out), jnp.float32) * scale
        return w, b

    keys = jax.random.split(key, 7)
    params = {}
    # preprocess net: Linear(OBS_DIM, STATE_DIM) + ReLU
    params["wp"], params["bp"] = lin(keys[0], OBS_DIM, STATE_DIM)
    # hyper_w_1: Linear(D, H) -> ReLU -> Linear(H, H*S)
    params["w1a"], params["b1a"] = lin(keys[1], STATE_DIM, HYPER_EMBED)
    params["w1b"], params["b1b"] = lin(keys[2], HYPER_EMBED, HS)
    # hyper_w_final: Linear(D, H) -> ReLU -> Linear(H, H*O*S)
    params["wfa"], params["bfa"] = lin(keys[3], STATE_DIM, HYPER_EMBED)
    params["wfb"], params["bfb"] = lin(keys[4], HYPER_EMBED, HOS)
    # hyper_b_1: Linear(D, H)
    params["wb1"], params["bb1"] = lin(keys[5], STATE_DIM, HYPER_EMBED)
    # hyper_b_final: Linear(D, O*S)
    params["wbf"], params["bbf"] = lin(keys[6], STATE_DIM, OS)
    return params


# --------------------------------- main -------------------------------------
if __name__ == "__main__":
    key = jax.random.PRNGKey(0)
    k_obs, k_tau, k_par, k_obs2, k_tau2 = jax.random.split(key, 5)

    params = init_params(k_par)
    prepared = prepare_params(params)   # built once, reused across forward calls

    # ---- small demo shape (B=2) ------------------------------------------
    obs = jax.random.normal(k_obs, (BATCH, OBS_DIM), jnp.float32)
    taus = jax.random.uniform(k_tau, (BATCH, SAMPLE_SIZE), jnp.float32)
    # TODO(synk): PyTorch draws taus with torch.rand at runtime; here they are a
    # deterministic jax.random.uniform draw fed to the kernel.

    (out, taus_out), hidden = monotone_iqn_forward(obs, taus, prepared)
    jax.block_until_ready(out)
    jax.block_until_ready(hidden)

    # sanity check vs. plain-JAX f32 reference (kernel uses bf16 MXU operands,
    # hence the slightly relaxed tolerance)
    (out_r, taus_r), hidden_r = monotone_iqn_reference(obs, taus, params)
    np.testing.assert_allclose(np.asarray(out), np.asarray(out_r),
                               rtol=3e-2, atol=3e-2)
    np.testing.assert_allclose(np.asarray(hidden), np.asarray(hidden_r),
                               rtol=3e-2, atol=3e-2)

    assert out.shape == (BATCH, OUTPUT_DIM, SAMPLE_SIZE)
    assert taus_out.shape == (BATCH, 1, SAMPLE_SIZE)
    assert hidden.shape == (BATCH, 1, HYPER_EMBED)

    # ---- larger batch: exercises the batch grid (grid=(2,)) + padding -----
    B2 = 260
    obs2 = jax.random.normal(k_obs2, (B2, OBS_DIM), jnp.float32)
    taus2 = jax.random.uniform(k_tau2, (B2, SAMPLE_SIZE), jnp.float32)
    (out2, _), hidden2 = monotone_iqn_forward(obs2, taus2, prepared)
    jax.block_until_ready(out2)
    (out2_r, _), hidden2_r = monotone_iqn_reference(obs2, taus2, params)
    np.testing.assert_allclose(np.asarray(out2), np.asarray(out2_r),
                               rtol=3e-2, atol=3e-2)
    np.testing.assert_allclose(np.asarray(hidden2), np.asarray(hidden2_r),
                               rtol=3e-2, atol=3e-2)

    print("KERNEL_OK")
</pallas_src>

<mosaic_0001>
module attributes {stable_mosaic.version = 11 : i64} {
  func.func @monotone_iqn_kernel(%arg0: i32, %arg1: memref<8x16xf32, #tpu.memory_space<vmem>>, %arg2: memref<8x8xf32, #tpu.memory_space<vmem>>, %arg3: memref<16x32xbf16, #tpu.memory_space<vmem>>, %arg4: memref<8x256xbf16, #tpu.memory_space<vmem>>, %arg5: memref<256x32xbf16, #tpu.memory_space<vmem>>, %arg6: memref<32x1408xbf16, #tpu.memory_space<vmem>>, %arg7: memref<1x1536xf32, #tpu.memory_space<vmem>>, %arg8: memref<8x128xf32, #tpu.memory_space<vmem>>) attributes {dimension_semantics = [#tpu.dimension_semantics<parallel>], iteration_bounds = array<i64: 1>, scalar_prefetch = 0 : i64, scratch_operands = 0 : i64, tpu.core_type = #tpu.core_type<tc>, window_params = [{transform_indices = @transform_0, window_bounds = array<i64: 8, 16>}, {transform_indices = @transform_1, window_bounds = array<i64: 8, 8>}, {pipeline_mode = #tpu.pipeline_mode<synchronous>, transform_indices = @transform_2, window_bounds = array<i64: 16, 32>}, {pipeline_mode = #tpu.pipeline_mode<synchronous>, transform_indices = @transform_3, window_bounds = array<i64: 8, 256>}, {pipeline_mode = #tpu.pipeline_mode<synchronous>, transform_indices = @transform_4, window_bounds = array<i64: 256, 32>}, {pipeline_mode = #tpu.pipeline_mode<synchronous>, transform_indices = @transform_5, window_bounds = array<i64: 32, 1408>}, {pipeline_mode = #tpu.pipeline_mode<synchronous>, transform_indices = @transform_6, window_bounds = array<i64: 1, 1536>}, {transform_indices = @transform_7, window_bounds = array<i64: 8, 128>}]} {
    %c0 = arith.constant 0 : index
    %c0_0 = arith.constant 0 : index
    %0 = vector.load %arg1[%c0, %c0_0] : memref<8x16xf32, #tpu.memory_space<vmem>>, vector<8x16xf32>
    %c0_1 = arith.constant 0 : index
    %c0_2 = arith.constant 0 : index
    %1 = vector.load %arg2[%c0_1, %c0_2] : memref<8x8xf32, #tpu.memory_space<vmem>>, vector<8x8xf32>
    %c0_3 = arith.constant 0 : index
    %c0_4 = arith.constant 0 : index
    %2 = vector.load %arg7[%c0_3, %c0_4] : memref<1x1536xf32, #tpu.memory_space<vmem>>, vector<1x32xf32>
    %c0_5 = arith.constant 0 : index
    %c128 = arith.constant 128 : index
    %3 = vector.load %arg7[%c0_5, %c128] : memref<1x1536xf32, #tpu.memory_space<vmem>>, vector<1x128xf32>
    %c0_6 = arith.constant 0 : index
    %c256 = arith.constant 256 : index
    %4 = vector.load %arg7[%c0_6, %c256] : memref<1x1536xf32, #tpu.memory_space<vmem>>, vector<1x256xf32>
    %c0_7 = arith.constant 0 : index
    %c512 = arith.constant 512 : index
    %5 = vector.load %arg7[%c0_7, %c512] : memref<1x1536xf32, #tpu.memory_space<vmem>>, vector<1x1024xf32>
    %6 = arith.truncf %0 : vector<8x16xf32> to vector<8x16xbf16>
    %c0_8 = arith.constant 0 : index
    %c0_9 = arith.constant 0 : index
    %7 = vector.load %arg3[%c0_8, %c0_9] : memref<16x32xbf16, #tpu.memory_space<vmem>>, vector<16x32xbf16>
    %cst = arith.constant dense<0.000000e+00> : vector<8x32xf32>
    %8 = tpu.matmul %6, %7, %cst {dimension_numbers = #tpu.dot_dimension_numbers<[1], [0], [0], [1], [0, 0, 1, 1], [], []>} : vector<8x16xbf16>, vector<16x32xbf16>, vector<8x32xf32> -> vector<8x32xf32>
    %9 = vector.broadcast %2 : vector<1x32xf32> to vector<8x32xf32>
    %10 = arith.addf %8, %9 : vector<8x32xf32>
    %cst_10 = arith.constant 0.000000e+00 : f32
    %11 = vector.broadcast %cst_10 : f32 to vector<8x32xf32>
    %12 = arith.maximumf %10, %11 : vector<8x32xf32>
    %13 = arith.truncf %12 : vector<8x32xf32> to vector<8x32xbf16>
    %c0_11 = arith.constant 0 : index
    %c0_12 = arith.constant 0 : index
    %14 = vector.load %arg6[%c0_11, %c0_12] : memref<32x1408xbf16, #tpu.memory_space<vmem>>, vector<32x128xbf16>
    %cst_13 = arith.constant dense<0.000000e+00> : vector<8x128xf32>
    %15 = tpu.matmul %13, %14, %cst_13 {dimension_numbers = #tpu.dot_dimension_numbers<[1], [0], [0], [1], [0, 0, 1, 1], [], []>} : vector<8x32xbf16>, vector<32x128xbf16>, vector<8x128xf32> -> vector<8x128xf32>
    %16 = vector.broadcast %3 : vector<1x128xf32> to vector<8x128xf32>
    %17 = arith.addf %15, %16 : vector<8x128xf32>
    %18 = vector.extract_strided_slice %17 {offsets = [0, 0], sizes = [8, 32], strides = [1, 1]} : vector<8x128xf32> to vector<8x32xf32>
    %cst_14 = arith.constant 0.000000e+00 : f32
    %19 = vector.broadcast %cst_14 : f32 to vector<8x32xf32>
    %20 = arith.maximumf %18, %19 : vector<8x32xf32>
    %21 = vector.extract_strided_slice %17 {offsets = [0, 32], sizes = [8, 32], strides = [1, 1]} : vector<8x128xf32> to vector<8x32xf32>
    %22 = vector.extract_strided_slice %17 {offsets = [0, 64], sizes = [8, 32], strides = [1, 1]} : vector<8x128xf32> to vector<8x32xf32>
    %cst_15 = arith.constant 0.000000e+00 : f32
    %23 = vector.broadcast %cst_15 : f32 to vector<8x32xf32>
    %24 = arith.maximumf %22, %23 : vector<8x32xf32>
    %25 = vector.extract_strided_slice %17 {offsets = [0, 96], sizes = [8, 32], strides = [1, 1]} : vector<8x128xf32> to vector<8x32xf32>
    %26 = arith.truncf %20 : vector<8x32xf32> to vector<8x32xbf16>
    %c0_16 = arith.constant 0 : index
    %c128_17 = arith.constant 128 : index
    %27 = vector.load %arg6[%c0_16, %c128_17] : memref<32x1408xbf16, #tpu.memory_space<vmem>>, vector<32x256xbf16>
    %cst_18 = arith.constant dense<0.000000e+00> : vector<8x256xf32>
    %28 = tpu.matmul %26, %27, %cst_18 {dimension_numbers = #tpu.dot_dimension_numbers<[1], [0], [0], [1], [0, 0, 1, 1], [], []>} : vector<8x32xbf16>, vector<32x256xbf16>, vector<8x256xf32> -> vector<8x256xf32>
    %29 = vector.broadcast %4 : vector<1x256xf32> to vector<8x256xf32>
    %30 = arith.addf %28, %29 : vector<8x256xf32>
    %31 = math.absf %30 : vector<8x256xf32>
    %32 = arith.truncf %1 : vector<8x8xf32> to vector<8x8xbf16>
    %c0_19 = arith.constant 0 : index
    %c0_20 = arith.constant 0 : index
    %33 = vector.load %arg4[%c0_19, %c0_20] : memref<8x256xbf16, #tpu.memory_space<vmem>>, vector<8x256xbf16>
    %cst_21 = arith.constant dense<0.000000e+00> : vector<8x256xf32>
    %34 = tpu.matmul %32, %33, %cst_21 {dimension_numbers = #tpu.dot_dimension_numbers<[1], [0], [0], [1], [0, 0, 1, 1], [], []>} : vector<8x8xbf16>, vector<8x256xbf16>, vector<8x256xf32> -> vector<8x256xf32>
    %35 = arith.mulf %34, %31 : vector<8x256xf32>
    %36 = arith.truncf %35 : vector<8x256xf32> to vector<8x256xbf16>
    %c0_22 = arith.constant 0 : index
    %c0_23 = arith.constant 0 : index
    %37 = vector.load %arg5[%c0_22, %c0_23] : memref<256x32xbf16, #tpu.memory_space<vmem>>, vector<256x32xbf16>
    %cst_24 = arith.constant dense<0.000000e+00> : vector<8x32xf32>
    %38 = tpu.matmul %36, %37, %cst_24 {dimension_numbers = #tpu.dot_dimension_numbers<[1], [0], [0], [1], [0, 0, 1, 1], [], []>} : vector<8x256xbf16>, vector<256x32xbf16>, vector<8x32xf32> -> vector<8x32xf32>
    %39 = arith.addf %38, %21 : vector<8x32xf32>
    %cst_25 = arith.constant 0.000000e+00 : f32
    %40 = vector.broadcast %cst_25 : f32 to vector<8x32xf32>
    %41 = arith.maximumf %39, %40 : vector<8x32xf32>
    %42 = arith.truncf %24 : vector<8x32xf32> to vector<8x32xbf16>
    %c0_26 = arith.constant 0 : index
    %c384 = arith.constant 384 : index
    %43 = vector.load %arg6[%c0_26, %c384] : memref<32x1408xbf16, #tpu.memory_space<vmem>>, vector<32x1024xbf16>
    %cst_27 = arith.constant dense<0.000000e+00> : vector<8x1024xf32>
    %44 = tpu.matmul %42, %43, %cst_27 {dimension_numbers = #tpu.dot_dimension_numbers<[1], [0], [0], [1], [0, 0, 1, 1], [], []>} : vector<8x32xbf16>, vector<32x1024xbf16>, vector<8x1024xf32> -> vector<8x1024xf32>
    %45 = vector.broadcast %5 : vector<1x1024xf32> to vector<8x1024xf32>
    %46 = arith.addf %44, %45 : vector<8x1024xf32>
    %47 = math.absf %46 : vector<8x1024xf32>
    %48 = vector.extract_strided_slice %41 {offsets = [0, 0], sizes = [8, 1], strides = [1, 1]} : vector<8x32xf32> to vector<8x1xf32>
    %49 = vector.extract_strided_slice %47 {offsets = [0, 0], sizes = [8, 32], strides = [1, 1]} : vector<8x1024xf32> to vector<8x32xf32>
    %50 = vector.broadcast %48 : vector<8x1xf32> to vector<8x32xf32>
    %51 = arith.mulf %50, %49 : vector<8x32xf32>
    %52 = arith.addf %25, %51 : vector<8x32xf32>
    %53 = vector.extract_strided_slice %41 {offsets = [0, 1], sizes = [8, 1], strides = [1, 1]} : vector<8x32xf32> to vector<8x1xf32>
    %54 = vector.extract_strided_slice %47 {offsets = [0, 32], sizes = [8, 32], strides = [1, 1]} : vector<8x1024xf32> to vector<8x32xf32>
    %55 = vector.broadcast %53 : vector<8x1xf32> to vector<8x32xf32>
    %56 = arith.mulf %55, %54 : vector<8x32xf32>
    %57 = arith.addf %52, %56 : vector<8x32xf32>
    %58 = vector.extract_strided_slice %41 {offsets = [0, 2], sizes = [8, 1], strides = [1, 1]} : vector<8x32xf32> to vector<8x1xf32>
    %59 = vector.extract_strided_slice %47 {offsets = [0, 64], sizes = [8, 32], strides = [1, 1]} : vector<8x1024xf32> to vector<8x32xf32>
    %60 = vector.broadcast %58 : vector<8x1xf32> to vector<8x32xf32>
    %61 = arith.mulf %60, %59 : vector<8x32xf32>
    %62 = arith.addf %57, %61 : vector<8x32xf32>
    %63 = vector.extract_strided_slice %41 {offsets = [0, 3], sizes = [8, 1], strides = [1, 1]} : vector<8x32xf32> to vector<8x1xf32>
    %64 = vector.extract_strided_slice %47 {offsets = [0, 96], sizes = [8, 32], strides = [1, 1]} : vector<8x1024xf32> to vector<8x32xf32>
    %65 = vector.broadcast %63 : vector<8x1xf32> to vector<8x32xf32>
    %66 = arith.mulf %65, %64 : vector<8x32xf32>
    %67 = arith.addf %62, %66 : vector<8x32xf32>
    %68 = vector.extract_strided_slice %41 {offsets = [0, 4], sizes = [8, 1], strides = [1, 1]} : vector<8x32xf32> to vector<8x1xf32>
    %69 = vector.extract_strided_slice %47 {offsets = [0, 128], sizes = [8, 32], strides = [1, 1]} : vector<8x1024xf32> to vector<8x32xf32>
    %70 = vector.broadcast %68 : vector<8x1xf32> to vector<8x32xf32>
    %71 = arith.mulf %70, %69 : vector<8x32xf32>
    %72 = arith.addf %67, %71 : vector<8x32xf32>
    %73 = vector.extract_strided_slice %41 {offsets = [0, 5], sizes = [8, 1], strides = [1, 1]} : vector<8x32xf32> to vector<8x1xf32>
    %74 = vector.extract_strided_slice %47 {offsets = [0, 160], sizes = [8, 32], strides = [1, 1]} : vector<8x1024xf32> to vector<8x32xf32>
    %75 = vector.broadcast %73 : vector<8x1xf32> to vector<8x32xf32>
    %76 = arith.mulf %75, %74 : vector<8x32xf32>
    %77 = arith.addf %72, %76 : vector<8x32xf32>
    %78 = vector.extract_strided_slice %41 {offsets = [0, 6], sizes = [8, 1], strides = [1, 1]} : vector<8x32xf32> to vector<8x1xf32>
    %79 = vector.extract_strided_slice %47 {offsets = [0, 192], sizes = [8, 32], strides = [1, 1]} : vector<8x1024xf32> to vector<8x32xf32>
    %80 = vector.broadcast %78 : vector<8x1xf32> to vector<8x32xf32>
    %81 = arith.mulf %80, %79 : vector<8x32xf32>
    %82 = arith.addf %77, %81 : vector<8x32xf32>
    %83 = vector.extract_strided_slice %41 {offsets = [0, 7], sizes = [8, 1], strides = [1, 1]} : vector<8x32xf32> to vector<8x1xf32>
    %84 = vector.extract_strided_slice %47 {offsets = [0, 224], sizes = [8, 32], strides = [1, 1]} : vector<8x1024xf32> to vector<8x32xf32>
    %85 = vector.broadcast %83 : vector<8x1xf32> to vector<8x32xf32>
    %86 = arith.mulf %85, %84 : vector<8x32xf32>
    %87 = arith.addf %82, %86 : vector<8x32xf32>
    %88 = vector.extract_strided_slice %41 {offsets = [0, 8], sizes = [8, 1], strides = [1, 1]} : vector<8x32xf32> to vector<8x1xf32>
    %89 = vector.extract_strided_slice %47 {offsets = [0, 256], sizes = [8, 32], strides = [1, 1]} : vector<8x1024xf32> to vector<8x32xf32>
    %90 = vector.broadcast %88 : vector<8x1xf32> to vector<8x32xf32>
    %91 = arith.mulf %90, %89 : vector<8x32xf32>
    %92 = arith.addf %87, %91 : vector<8x32xf32>
    %93 = vector.extract_strided_slice %41 {offsets = [0, 9], sizes = [8, 1], strides = [1, 1]} : vector<8x32xf32> to vector<8x1xf32>
    %94 = vector.extract_strided_slice %47 {offsets = [0, 288], sizes = [8, 32], strides = [1, 1]} : vector<8x1024xf32> to vector<8x32xf32>
    %95 = vector.broadcast %93 : vector<8x1xf32> to vector<8x32xf32>
    %96 = arith.mulf %95, %94 : vector<8x32xf32>
    %97 = arith.addf %92, %96 : vector<8x32xf32>
    %98 = vector.extract_strided_slice %41 {offsets = [0, 10], sizes = [8, 1], strides = [1, 1]} : vector<8x32xf32> to vector<8x1xf32>
    %99 = vector.extract_strided_slice %47 {offsets = [0, 320], sizes = [8, 32], strides = [1, 1]} : vector<8x1024xf32> to vector<8x32xf32>
    %100 = vector.broadcast %98 : vector<8x1xf32> to vector<8x32xf32>
    %101 = arith.mulf %100, %99 : vector<8x32xf32>
    %102 = arith.addf %97, %101 : vector<8x32xf32>
    %103 = vector.extract_strided_slice %41 {offsets = [0, 11], sizes = [8, 1], strides = [1, 1]} : vector<8x32xf32> to vector<8x1xf32>
    %104 = vector.extract_strided_slice %47 {offsets = [0, 352], sizes = [8, 32], strides = [1, 1]} : vector<8x1024xf32> to vector<8x32xf32>
    %105 = vector.broadcast %103 : vector<8x1xf32> to vector<8x32xf32>
    %106 = arith.mulf %105, %104 : vector<8x32xf32>
    %107 = arith.addf %102, %106 : vector<8x32xf32>
    %108 = vector.extract_strided_slice %41 {offsets = [0, 12], sizes = [8, 1], strides = [1, 1]} : vector<8x32xf32> to vector<8x1xf32>
    %109 = vector.extract_strided_slice %47 {offsets = [0, 384], sizes = [8, 32], strides = [1, 1]} : vector<8x1024xf32> to vector<8x32xf32>
    %110 = vector.broadcast %108 : vector<8x1xf32> to vector<8x32xf32>
    %111 = arith.mulf %110, %109 : vector<8x32xf32>
    %112 = arith.addf %107, %111 : vector<8x32xf32>
    %113 = vector.extract_strided_slice %41 {offsets = [0, 13], sizes = [8, 1], strides = [1, 1]} : vector<8x32xf32> to vector<8x1xf32>
    %114 = vector.extract_strided_slice %47 {offsets = [0, 416], sizes = [8, 32], strides = [1, 1]} : vector<8x1024xf32> to vector<8x32xf32>
    %115 = vector.broadcast %113 : vector<8x1xf32> to vector<8x32xf32>
    %116 = arith.mulf %115, %114 : vector<8x32xf32>
    %117 = arith.addf %112, %116 : vector<8x32xf32>
    %118 = vector.extract_strided_slice %41 {offsets = [0, 14], sizes = [8, 1], strides = [1, 1]} : vector<8x32xf32> to vector<8x1xf32>
    %119 = vector.extract_strided_slice %47 {offsets = [0, 448], sizes = [8, 32], strides = [1, 1]} : vector<8x1024xf32> to vector<8x32xf32>
    %120 = vector.broadcast %118 : vector<8x1xf32> to vector<8x32xf32>
    %121 = arith.mulf %120, %119 : vector<8x32xf32>
    %122 = arith.addf %117, %121 : vector<8x32xf32>
    %123 = vector.extract_strided_slice %41 {offsets = [0, 15], sizes = [8, 1], strides = [1, 1]} : vector<8x32xf32> to vector<8x1xf32>
    %124 = vector.extract_strided_slice %47 {offsets = [0, 480], sizes = [8, 32], strides = [1, 1]} : vector<8x1024xf32> to vector<8x32xf32>
    %125 = vector.broadcast %123 : vector<8x1xf32> to vector<8x32xf32>
    %126 = arith.mulf %125, %124 : vector<8x32xf32>
    %127 = arith.addf %122, %126 : vector<8x32xf32>
    %128 = vector.extract_strided_slice %41 {offsets = [0, 16], sizes = [8, 1], strides = [1, 1]} : vector<8x32xf32> to vector<8x1xf32>
    %129 = vector.extract_strided_slice %47 {offsets = [0, 512], sizes = [8, 32], strides = [1, 1]} : vector<8x1024xf32> to vector<8x32xf32>
    %130 = vector.broadcast %128 : vector<8x1xf32> to vector<8x32xf32>
    %131 = arith.mulf %130, %129 : vector<8x32xf32>
    %132 = arith.addf %127, %131 : vector<8x32xf32>
    %133 = vector.extract_strided_slice %41 {offsets = [0, 17], sizes = [8, 1], strides = [1, 1]} : vector<8x32xf32> to vector<8x1xf32>
    %134 = vector.extract_strided_slice %47 {offsets = [0, 544], sizes = [8, 32], strides = [1, 1]} : vector<8x1024xf32> to vector<8x32xf32>
    %135 = vector.broadcast %133 : vector<8x1xf32> to vector<8x32xf32>
    %136 = arith.mulf %135, %134 : vector<8x32xf32>
    %137 = arith.addf %132, %136 : vector<8x32xf32>
    %138 = vector.extract_strided_slice %41 {offsets = [0, 18], sizes = [8, 1], strides = [1, 1]} : vector<8x32xf32> to vector<8x1xf32>
    %139 = vector.extract_strided_slice %47 {offsets = [0, 576], sizes = [8, 32], strides = [1, 1]} : vector<8x1024xf32> to vector<8x32xf32>
    %140 = vector.broadcast %138 : vector<8x1xf32> to vector<8x32xf32>
    %141 = arith.mulf %140, %139 : vector<8x32xf32>
    %142 = arith.addf %137, %141 : vector<8x32xf32>
    %143 = vector.extract_strided_slice %41 {offsets = [0, 19], sizes = [8, 1], strides = [1, 1]} : vector<8x32xf32> to vector<8x1xf32>
    %144 = vector.extract_strided_slice %47 {offsets = [0, 608], sizes = [8, 32], strides = [1, 1]} : vector<8x1024xf32> to vector<8x32xf32>
    %145 = vector.broadcast %143 : vector<8x1xf32> to vector<8x32xf32>
    %146 = arith.mulf %145, %144 : vector<8x32xf32>
    %147 = arith.addf %142, %146 : vector<8x32xf32>
    %148 = vector.extract_strided_slice %41 {offsets = [0, 20], sizes = [8, 1], strides = [1, 1]} : vector<8x32xf32> to vector<8x1xf32>
    %149 = vector.extract_strided_slice %47 {offsets = [0, 640], sizes = [8, 32], strides = [1, 1]} : vector<8x1024xf32> to vector<8x32xf32>
    %150 = vector.broadcast %148 : vector<8x1xf32> to vector<8x32xf32>
    %151 = arith.mulf %150, %149 : vector<8x32xf32>
    %152 = arith.addf %147, %151 : vector<8x32xf32>
    %153 = vector.extract_strided_slice %41 {offsets = [0, 21], sizes = [8, 1], strides = [1, 1]} : vector<8x32xf32> to vector<8x1xf32>
    %154 = vector.extract_strided_slice %47 {offsets = [0, 672], sizes = [8, 32], strides = [1, 1]} : vector<8x1024xf32> to vector<8x32xf32>
    %155 = vector.broadcast %153 : vector<8x1xf32> to vector<8x32xf32>
    %156 = arith.mulf %155, %154 : vector<8x32xf32>
    %157 = arith.addf %152, %156 : vector<8x32xf32>
    %158 = vector.extract_strided_slice %41 {offsets = [0, 22], sizes = [8, 1], strides = [1, 1]} : vector<8x32xf32> to vector<8x1xf32>
    %159 = vector.extract_strided_slice %47 {offsets = [0, 704], sizes = [8, 32], strides = [1, 1]} : vector<8x1024xf32> to vector<8x32xf32>
    %160 = vector.broadcast %158 : vector<8x1xf32> to vector<8x32xf32>
    %161 = arith.mulf %160, %159 : vector<8x32xf32>
    %162 = arith.addf %157, %161 : vector<8x32xf32>
    %163 = vector.extract_strided_slice %41 {offsets = [0, 23], sizes = [8, 1], strides = [1, 1]} : vector<8x32xf32> to vector<8x1xf32>
    %164 = vector.extract_strided_slice %47 {offsets = [0, 736], sizes = [8, 32], strides = [1, 1]} : vector<8x1024xf32> to vector<8x32xf32>
    %165 = vector.broadcast %163 : vector<8x1xf32> to vector<8x32xf32>
    %166 = arith.mulf %165, %164 : vector<8x32xf32>
    %167 = arith.addf %162, %166 : vector<8x32xf32>
    %168 = vector.extract_strided_slice %41 {offsets = [0, 24], sizes = [8, 1], strides = [1, 1]} : vector<8x32xf32> to vector<8x1xf32>
    %169 = vector.extract_strided_slice %47 {offsets = [0, 768], sizes = [8, 32], strides = [1, 1]} : vector<8x1024xf32> to vector<8x32xf32>
    %170 = vector.broadcast %168 : vector<8x1xf32> to vector<8x32xf32>
    %171 = arith.mulf %170, %169 : vector<8x32xf32>
    %172 = arith.addf %167, %171 : vector<8x32xf32>
    %173 = vector.extract_strided_slice %41 {offsets = [0, 25], sizes = [8, 1], strides = [1, 1]} : vector<8x32xf32> to vector<8x1xf32>
    %174 = vector.extract_strided_slice %47 {offsets = [0, 800], sizes = [8, 32], strides = [1, 1]} : vector<8x1024xf32> to vector<8x32xf32>
    %175 = vector.broadcast %173 : vector<8x1xf32> to vector<8x32xf32>
    %176 = arith.mulf %175, %174 : vector<8x32xf32>
    %177 = arith.addf %172, %176 : vector<8x32xf32>
    %178 = vector.extract_strided_slice %41 {offsets = [0, 26], sizes = [8, 1], strides = [1, 1]} : vector<8x32xf32> to vector<8x1xf32>
    %179 = vector.extract_strided_slice %47 {offsets = [0, 832], sizes = [8, 32], strides = [1, 1]} : vector<8x1024xf32> to vector<8x32xf32>
    %180 = vector.broadcast %178 : vector<8x1xf32> to vector<8x32xf32>
    %181 = arith.mulf %180, %179 : vector<8x32xf32>
    %182 = arith.addf %177, %181 : vector<8x32xf32>
    %183 = vector.extract_strided_slice %41 {offsets = [0, 27], sizes = [8, 1], strides = [1, 1]} : vector<8x32xf32> to vector<8x1xf32>
    %184 = vector.extract_strided_slice %47 {offsets = [0, 864], sizes = [8, 32], strides = [1, 1]} : vector<8x1024xf32> to vector<8x32xf32>
    %185 = vector.broadcast %183 : vector<8x1xf32> to vector<8x32xf32>
    %186 = arith.mulf %185, %184 : vector<8x32xf32>
    %187 = arith.addf %182, %186 : vector<8x32xf32>
    %188 = vector.extract_strided_slice %41 {offsets = [0, 28], sizes = [8, 1], strides = [1, 1]} : vector<8x32xf32> to vector<8x1xf32>
    %189 = vector.extract_strided_slice %47 {offsets = [0, 896], sizes = [8, 32], strides = [1, 1]} : vector<8x1024xf32> to vector<8x32xf32>
    %190 = vector.broadcast %188 : vector<8x1xf32> to vector<8x32xf32>
    %191 = arith.mulf %190, %189 : vector<8x32xf32>
    %192 = arith.addf %187, %191 : vector<8x32xf32>
    %193 = vector.extract_strided_slice %41 {offsets = [0, 29], sizes = [8, 1], strides = [1, 1]} : vector<8x32xf32> to vector<8x1xf32>
    %194 = vector.extract_strided_slice %47 {offsets = [0, 928], sizes = [8, 32], strides = [1, 1]} : vector<8x1024xf32> to vector<8x32xf32>
    %195 = vector.broadcast %193 : vector<8x1xf32> to vector<8x32xf32>
    %196 = arith.mulf %195, %194 : vector<8x32xf32>
    %197 = arith.addf %192, %196 : vector<8x32xf32>
    %198 = vector.extract_strided_slice %41 {offsets = [0, 30], sizes = [8, 1], strides = [1, 1]} : vector<8x32xf32> to vector<8x1xf32>
    %199 = vector.extract_strided_slice %47 {offsets = [0, 960], sizes = [8, 32], strides = [1, 1]} : vector<8x1024xf32> to vector<8x32xf32>
    %200 = vector.broadcast %198 : vector<8x1xf32> to vector<8x32xf32>
    %201 = arith.mulf %200, %199 : vector<8x32xf32>
    %202 = arith.addf %197, %201 : vector<8x32xf32>
    %203 = vector.extract_strided_slice %41 {offsets = [0, 31], sizes = [8, 1], strides = [1, 1]} : vector<8x32xf32> to vector<8x1xf32>
    %204 = vector.extract_strided_slice %47 {offsets = [0, 992], sizes = [8, 32], strides = [1, 1]} : vector<8x1024xf32> to vector<8x32xf32>
    %205 = vector.broadcast %203 : vector<8x1xf32> to vector<8x32xf32>
    %206 = arith.mulf %205, %204 : vector<8x32xf32>
    %207 = arith.addf %202, %206 : vector<8x32xf32>
    %c0_28 = arith.constant 0 : index
    %c0_29 = arith.constant 0 : index
    %208 = vector.load %arg8[%c0_28, %c0_29] : memref<8x128xf32, #tpu.memory_space<vmem>>, vector<8x32xf32>
    tpu.vector_store %arg8[%c0_28, %c0_29], %207 {strides = array<i32>} : memref<8x128xf32, #tpu.memory_space<vmem>>, vector<8x32xf32>,
    %c0_30 = arith.constant 0 : index
    %c32 = arith.constant 32 : index
    %209 = vector.load %arg8[%c0_30, %c32] : memref<8x128xf32, #tpu.memory_space<vmem>>, vector<8x32xf32>
    tpu.vector_store %arg8[%c0_30, %c32], %41 {strides = array<i32>} : memref<8x128xf32, #tpu.memory_space<vmem>>, vector<8x32xf32>,
    %cst_31 = arith.constant 0.000000e+00 : f32
    %210 = vector.broadcast %cst_31 : f32 to vector<8x64xf32>
    %c0_32 = arith.constant 0 : index
    %c64 = arith.constant 64 : index
    %211 = vector.load %arg8[%c0_32, %c64] : memref<8x128xf32, #tpu.memory_space<vmem>>, vector<8x64xf32>
    tpu.vector_store %arg8[%c0_32, %c64], %210 {strides = array<i32>} : memref<8x128xf32, #tpu.memory_space<vmem>>, vector<8x64xf32>,
    return
  }
  func.func @transform_0(%arg0: i32) -> (i32, i32) {
    %c0_i32 = arith.constant 0 : i32
    %c0_i32_0 = arith.constant 0 : i32
    return %arg0, %c0_i32 : i32, i32
  }
  func.func @transform_1(%arg0: i32) -> (i32, i32) {
    %c0_i32 = arith.constant 0 : i32
    %c0_i32_0 = arith.constant 0 : i32
    return %arg0, %c0_i32 : i32, i32
  }
  func.func @transform_2(%arg0: i32) -> (i32, i32) {
    %c0_i32 = arith.constant 0 : i32
    %c0_i32_0 = arith.constant 0 : i32
    %c0_i32_1 = arith.constant 0 : i32
    return %c0_i32, %c0_i32_0 : i32, i32
  }
  func.func @transform_3(%arg0: i32) -> (i32, i32) {
    %c0_i32 = arith.constant 0 : i32
    %c0_i32_0 = arith.constant 0 : i32
    %c0_i32_1 = arith.constant 0 : i32
    return %c0_i32, %c0_i32_0 : i32, i32
  }
  func.func @transform_4(%arg0: i32) -> (i32, i32) {
    %c0_i32 = arith.constant 0 : i32
    %c0_i32_0 = arith.constant 0 : i32
    %c0_i32_1 = arith.constant 0 : i32
    return %c0_i32, %c0_i32_0 : i32, i32
  }
  func.func @transform_5(%arg0: i32) -> (i32, i32) {
    %c0_i32 = arith.constant 0 : i32
    %c0_i32_0 = arith.constant 0 : i32
    %c0_i32_1 = arith.constant 0 : i32
    return %c0_i32, %c0_i32_0 : i32, i32
  }
  func.func @transform_6(%arg0: i32) -> (i32, i32) {
    %c0_i32 = arith.constant 0 : i32
    %c0_i32_0 = arith.constant 0 : i32
    %c0_i32_1 = arith.constant 0 : i32
    return %c0_i32, %c0_i32_0 : i32, i32
  }
  func.func @transform_7(%arg0: i32) -> (i32, i32) {
    %c0_i32 = arith.constant 0 : i32
    %c0_i32_0 = arith.constant 0 : i32
    return %arg0, %c0_i32 : i32, i32
  }
}

</mosaic_0001>

<bundles_post_ra>
// kernel: monotone_iqn_forward.1
= control target key start
LH: loop header
LB: loop body
LE: loop exit
PB: predicated region body
PF: predicated region fallthrough
CT: control target
= control target key end

     0   :  { %12 = vsyncpa [#allocation3], 0  ;;  %s1829_s0 = inlined_call_operand.vmem [shape: f32[8,16], index: 0, kind: input, shape index: {}]   ;;  %s1830_s1 = inlined_call_operand.vmem [shape: f32[8,8], index: 1, kind: input, shape index: {}]   ;;  %s1831_s2 = inlined_call_operand.hbm [shape: bf16[16,32], index: 2, kind: input, shape index: {}]   ;;  %s1832_s3 = inlined_call_operand.hbm [shape: bf16[8,256], index: 3, kind: input, shape index: {}]   ;;  %s1833_s4 = inlined_call_operand.vmem [shape: bf16[256,32], index: 4, kind: input, shape index: {}]   ;;  %s1834_s5 = inlined_call_operand.vmem [shape: bf16[32,1408], index: 5, kind: input, shape index: {}]   ;;  %s1835_s6 = inlined_call_operand.vmem [shape: f32[1,1536], index: 6, kind: input, shape index: {}]   ;;  %s1836_s7 = inlined_call_operand.vmem [shape: f32[8,128], index: 7, kind: output, shape index: {}]  }
   0x1   :  { %13 = vsyncpa [#allocation5], 0  ;;  %s1392_s24 = smov [#allocation2]   ;;  %s1344_s28 = scalar_lea.hbm %s1831_s2, 128 }
   0x2   :  { %s23_s25 = sshll.u32 %s1392_s24, 4  ;;  %p1345_p0 = scmp.ne.s32.totalorder %s1831_s2, %s1344_s28  ;;  %s24_s25 = int_to_ptr.vmem [resolvable:$true] %s23_s25 }
   0x3   :  { %p1348_p1 = scmp.lt.u32.totalorder %s1344_s28, %s1831_s2 }
   0x5   :  { %p1350_p2 = pnand %p1348_p1, %p1345_p0 }
   0x7   :  { %1353 = shalt.err (!%p1350_p2)
}
   0x8   :  { %s1354_s10 = scalar_lea.vmem %s24_s25, 128  ;;  %p1359_p4 = scmp.lt.s32.totalorder %s24_s25, %s24_s25 }
   0x9   :  { %p1355_p3 = scmp.ne.s32.totalorder %s24_s25, %s1354_s10  ;;  %p1360_p5 = scmp.lt.s32.totalorder %s1354_s10, %s1354_s10 }
   0xb   :  { %p1361_p6 = por %p1360_p5, %p1359_p4 }
   0xd   :  { %p1362_p7 = pnand %p1361_p6, %p1355_p3 }
   0xf   :  { %1365 = shalt.err (!%p1362_p7)
}
  0x10   :  { %s1393_s11 = smov 64   ;;  %s1394_s12 = smov 4  }
  0x11   :  { %29 = dma.hbm_to_vmem [thread:$0]  %s1831_s2, 128, %s24_s25, [#allocation3], %s1393_s11, %s1393_s11, %s1394_s12  }
  0x12   :  { %s1395_s15 = smov [#allocation4]   ;;  %s1366_s19 = scalar_lea.hbm %s1832_s3, 128 }
  0x13   :  { %s36_s16 = sshll.u32 %s1395_s15, 4  ;;  %p1367_p8 = scmp.ne.s32.totalorder %s1832_s3, %s1366_s19  ;;  %s37_s16 = int_to_ptr.vmem [resolvable:$true] %s36_s16 }
  0x14   :  { %p1370_p9 = scmp.lt.u32.totalorder %s1366_s19, %s1832_s3 }
  0x16   :  { %p1372_p10 = pnand %p1370_p9, %p1367_p8 }
  0x18   :  { %1375 = shalt.err (!%p1372_p10)
}
  0x19   :  { %s1376_s24 = scalar_lea.vmem %s37_s16, 128  ;;  %p1381_p12 = scmp.lt.s32.totalorder %s37_s16, %s37_s16 }
  0x1a   :  { %p1377_p11 = scmp.ne.s32.totalorder %s37_s16, %s1376_s24  ;;  %p1382_p13 = scmp.lt.s32.totalorder %s1376_s24, %s1376_s24 }
  0x1c   :  { %p1383_p0 = por %p1382_p13, %p1381_p12 }
  0x1e   :  { %p1384_p1 = pnand %p1383_p0, %p1377_p11 }
  0x20   :  { %1387 = shalt.err (!%p1384_p1)
}
  0x21   :  { %39 = dma.hbm_to_vmem [thread:$0]  %s1832_s3, 128, %s37_s16, [#allocation5]  }
  0x22   :  { %1388 = dma.done.wait [#allocation3], 128  }
  0x23   :  { %1389 = vsyncadd [#allocation3], 4294967168 }
  0x24   :  { %1390 = dma.done.wait [#allocation5], 128  }
  0x25   :  { %1391 = vsyncadd [#allocation5], 4294967168  ;;  %v1396_v0 = vmov 0.0   ;;  %vm1397_vm0 = vmmov 0   ;;  %v1293_v1 = vld [vmem:[#allocation2] sm:$0xff]   ;;  %vm74_vm1 = vcmask 130048  }
  0x26   :  { %1206 = vmatprep.subr.bf16.mxu0 %v1396_v0  ;;  %1208 = vmatprep.mubr.msk.bf16.mxu0 %vm1397_vm0, %v1396_v0  ;;  %v53_v2 = vld [vmem:[%s1829_s0] sm:$0xff]  ;;  %v1298_v7 = vld [vmem:[%s1834_s5 + $0x8] ss:$44 sps:$4 sm:$0xff]   ;;  %vm142_vm2 = vcmask 261120   ;;  %vm280_vm3 = vcmask 1043456   ;;  %v1398_v22 = vmov 0  }
  0x27   :  { %1212 = vmatprep.subr.bf16.mxu1 %v1396_v0  ;;  %1216 = vmatprep.mubr.msk.bf16.mxu1 %vm1397_vm0, %v1396_v0  ;;  %v59_v3 = vpack.c.bf16 %v53_v2, %v53_v2  ;;  %v1294_v4 = vld [vmem:[%s1834_s5] ss:$44 sps:$4 sm:$0xff]   ;;  %v1295_v5 = vld [vmem:[%s1834_s5 + $0x58] ss:$44 sps:$4 sm:$0xff]   ;;  %v1299_v18 = vld [vmem:[%s1834_s5 + $0x5c] ss:$44 sps:$4 sm:$0xff]  }
  0x28   :  { %1207 = vmatpush3.bf16.msra.mxu0 %v1293_v1  ;;  %1213 = vmatpush3.bf16.msra.mxu1 %v1294_v4  ;;  %v1296_v6 = vld [vmem:[%s1834_s5 + $0x4] ss:$44 sps:$4 sm:$0xff]   ;;  %v1127_v8 = vld [vmem:[%s1835_s6] ss:$0 sm:$0xff]  ;;  %v270_v17 = vld [vmem:[#allocation4] sm:$0xff]  ;;  %vm276_vm4 = vcmask 64512  }
  0x29   :  { %1214 = vmatprep.subr.bf16.mxu1 %v1396_v0  ;;  %226 = vmatprep.subr.bf16.mxu0 %v1298_v7  ;;  %v1301_v16 = vld [vmem:[%s1834_s5 + $0x60] ss:$44 sps:$4 sm:$0xff]   ;;  %v1140_v19 = vcombine.high %v270_v17, %v270_v17  ;;  %v1139_v20 = vcombine.low %v270_v17, %v270_v17  ;;  %v1306_v26 = vld [vmem:[%s1834_s5 + $0x10] ss:$44 sps:$4 sm:$0xff]   ;;  %v1309_v27 = vld [vmem:[%s1834_s5 + $0x68] ss:$44 sps:$4 sm:$0xff]   ;;  %v193_v7 = vlaneseq }
  0x2a   :  { %v54_v23 = vld [vmem:[%s1830_s1] sm:$0xff]  ;;  %1260 = vset.pattern.permute.xlu1 %v1398_v22  ;;  %v1304_v25 = vld [vmem:[%s1834_s5 + $0xc] ss:$44 sps:$4 sm:$0xff]   ;;  %s1399_s29 = smov 96   ;;  %v1332_v42 = vld [vmem:[%s1833_s4 + $0x50] sm:$0xff]   ;;  %vm1117_vm5 = vcmask 523520  }
  0x2b   :  { %1209 = vmatmul.mubr.msk.bf16.vlgmr.msra.gmra.mrb[0].mxu0 %vm74_vm1, %v59_v3  ;;  %v282_v21 = vsel %vm280_vm3, %v1139_v20, 0  ;;  %v269_v24 = vpack.c.bf16 %v54_v23, %v54_v23  ;;  %v1307_v28 = vld [vmem:[%s1834_s5 + $0x64] ss:$44 sps:$4 sm:$0xff]   ;;  %v1130_v30 = vld [vmem:[%s1835_s6 + $0x1] ss:$0 sm:$0xff]  ;;  %v1330_v40 = vld [vmem:[%s1833_s4 + $0x48] sm:$0xff]  }
  0x2c   :  { %1215 = vmatpush3.bf16.msra.mxu1 %v1295_v5  ;;  %227 = vmatpush1.bf16.msra.mxu0 %v1296_v6  ;;  %v1312_v29 = vld [vmem:[%s1834_s5 + $0x18] ss:$44 sps:$4 sm:$0xff]   ;;  %v1331_v41 = vld [vmem:[%s1833_s4 + $0x8] sm:$0xff]   ;;  %v1333_v43 = vld [vmem:[%s1833_s4 + $0x10] sm:$0xff]   ;;  %vm1119_vm6 = vcmask 1048064  }
  0x2d   :  { %228 = vmatprep.subr.bf16.mxu0 %v1301_v16  ;;  %1141 = vmatprep.subr.msk.bf16.mxu1 %vm280_vm3, %v1140_v19  ;;  %v1328_v38 = vld [vmem:[%s1833_s4 + $0x40] sm:$0xff]   ;;  %v1334_v44 = vld [vmem:[%s1833_s4 + $0x58] sm:$0xff]   ;;  %v1338_v48 = vld [vmem:[%s1833_s4 + $0x68] sm:$0xff]  }
  0x2e   :  { %258 = vmatprep.mubr.bf16.mxu0 %v1398_v22  ;;  %v1329_v39 = vld [vmem:[%s1833_s4] sm:$0xff]   ;;  %v1335_v45 = vld [vmem:[%s1833_s4 + $0x18] sm:$0xff]   ;;  %v1339_v49 = vld [vmem:[%s1833_s4 + $0x28] sm:$0xff]  }
  0x2f   :  { %v1336_v46 = vld [vmem:[%s1833_s4 + $0x60] sm:$0xff]   ;;  %v1340_v51 = vld [vmem:[%s1833_s4 + $0x70] sm:$0xff]   ;;  %v1342_v56 = vld [vmem:[%s1833_s4 + $0x78] sm:$0xff]  }
  0x30   :  { %229 = vmatpush1.bf16.msra.mxu0 %v1299_v18  ;;  %v1337_v47 = vld [vmem:[%s1833_s4 + $0x20] sm:$0xff]   ;;  %v1341_v53 = vld [vmem:[%s1833_s4 + $0x30] sm:$0xff]   ;;  %v1343_v57 = vld [vmem:[%s1833_s4 + $0x38] sm:$0xff]  }
  0x31   :  { %1184 = vmatprep.subr.bf16.mxu0 %v1328_v38  ;;  %v1310_v58 = vld [vmem:[%s1834_s5 + $0x14] ss:$44 sps:$4 sm:$0xff]   ;;  %v1315_v59 = vld [vmem:[%s1834_s5 + $0x70] ss:$44 sps:$4 sm:$0xff]   ;;  %v1313_v61 = vld [vmem:[%s1834_s5 + $0x6c] ss:$44 sps:$4 sm:$0xff]  }
  0x32   :  { %v1318_v62 = vld [vmem:[%s1834_s5 + $0x20] ss:$44 sps:$4 sm:$0xff]   ;;  %v1316_v63 = vld [vmem:[%s1834_s5 + $0x1c] ss:$44 sps:$4 sm:$0xff]   ;;  %v1321_v1 = vld [vmem:[%s1834_s5 + $0x78] ss:$44 sps:$4 sm:$0xff]  }
  0x33   :  { %v1319_v2 = vld [vmem:[%s1834_s5 + $0x74] ss:$44 sps:$4 sm:$0xff]   ;;  %v1322_v4 = vld [vmem:[%s1834_s5 + $0x24] ss:$44 sps:$4 sm:$0xff]   ;;  %v1325_v6 = vld [vmem:[%s1834_s5 + $0x7c] ss:$44 sps:$4 sm:$0xff]  }
  0x34   :  { %v1324_v3 = vld [vmem:[%s1834_s5 + $0x28] ss:$44 sps:$4 sm:$0xff]   ;;  %v1327_v5 = vld [vmem:[%s1834_s5 + $0x80] ss:$44 sps:$4 sm:$0xff]  }
  0xfe   :  { %v112_v9 = vpop.f32.mrb[0].mxu0 }
  0xff   :  { %v113_v10 = vadd.f32 %v1127_v8, %v112_v9  ;;  %v1210_v11 = vpop.f32.mrb[1].mxu0  ;;  %v1648_v8 = vshrl.u32 %v193_v7, 7  ;;  %v1419_v7 = vmov 21  }
 0x100   :  { %v115_v12 = vpop.f32.mrb[2].mxu0 }
 0x101   :  { %v118_v13 = vmax.f32 %v113_v10, 0.0  ;;  %v1211_v14 = vpop.f32.mrb[3].mxu0  ;;  %v195_v9 = vsub.s32 0, %v1648_v8  ;;  %v57_v10 = vld [vmem:[%s1835_s6 + $0x2] sm:$0x3]  ;;  %v199_v11 = vsub.s32 1, %v1648_v8 }
 0x103   :  { %v119_v15 = vpack.c.bf16 %v118_v13, %v118_v13  ;;  %v196_v12 = vrot.slane %v57_v10, %v195_v9  ;;  %v200_v13 = vrot.slane %v57_v10, %v199_v11  ;;  %v1420_v10 = vmov 24  }
 0x105   :  { %1217 = vmatmul.mubr.msk.bf16.vlgmr.msra.gmra.mrb[0].mxu1 %vm142_vm2, %v119_v15 }
 0x106   :  { %288 = vmatpush1.bf16.msra.mxu1 %v282_v21  ;;  %319 = vmatprep.mubr.bf16.mxu1 %v1398_v22 }
 0x107   :  { %648 = vmatprep.subr.bf16.mxu1 %v1306_v26  ;;  %v1400_v26 = vmov 2  }
 0x108   :  { %1262 = vset.pattern.permute.xlu0 %v1400_v26 }
 0x10d   :  { %1142 = vmatmul.mubr.msk.bf16.vlgmr.msra.gmra.mrb[4].mxu1 %vm276_vm4, %v269_v24 }
 0x10e   :  { %680 = vmatprep.mubr.bf16.mxu1 %v1398_v22  ;;  %649 = vmatpush1.bf16.msra.mxu1 %v1304_v25 }
 0x10f   :  { %650 = vmatprep.subr.bf16.mxu1 %v1309_v27 }
 0x112   :  { %651 = vmatpush1.bf16.msra.mxu1 %v1307_v28 }
 0x113   :  { %689 = vmatprep.subr.bf16.mxu1 %v1312_v29 }
 0x1d8   :  { %v180_v31 = vpop.f32.mrb[0].mxu1 }
 0x1d9   :  { %v1553_v32 = vadd.f32 %v1130_v30, %v180_v31  ;;  %v1218_v33 = vpop.f32.mrb[1].mxu1 }
 0x1da   :  { %v183_v34 = vpop.f32.mrb[2].mxu1 }
 0x1db   :  { %v1219_v35 = vpop.f32.mrb[3].mxu1  ;;  %v186_v36 = vmax.f32 %v1553_v32, 0.0 }
 0x1dd   :  { %v187_v37 = vpack.c.bf16 %v186_v36, %v186_v36 }
 0x1df   :  { %563 = vrot.lane.b32.xlu0 %v187_v37, %s1393_s11  ;;  %1138 = vmatmul.mubr.msk.bf16.vlgmr.msra.gmra.mrb[4].mxu0 %vm142_vm2, %v187_v37 }
 0x1e0   :  { %1185 = vmatpush3.bf16.msra.mxu0 %v1329_v39  ;;  %v321_v50 = vpop.f32.mrb[4].mxu1 }
 0x1e1   :  { %1186 = vmatprep.subr.bf16.mxu0 %v1330_v40  ;;  %v323_v52 = vpop.f32.mrb[5].mxu1 }
 0x1e2   :  { %v325_v54 = vpop.f32.mrb[6].mxu1 }
 0x1e3   :  { %461 = vrot.lane.b32.xlu0 %v1553_v32, %s1399_s29  ;;  %v326_v55 = vpop.f32.mrb[7].mxu1  ;;  %v1403_v54 = vmov 10  }
 0x1e4   :  { %1187 = vmatpush3.bf16.msra.mxu0 %v1331_v41  ;;  %v1404_v55 = vmov 4  }
 0x1e5   :  { %1188 = vmatprep.subr.bf16.mxu0 %v1332_v42 }
 0x1e8   :  { %1189 = vmatpush3.bf16.msra.mxu0 %v1333_v43 }
 0x1e9   :  { %1190 = vmatprep.subr.bf16.mxu0 %v1334_v44 }
 0x1ec   :  { %1191 = vmatpush3.bf16.msra.mxu0 %v1335_v45 }
 0x1ed   :  { %1192 = vmatprep.subr.bf16.mxu0 %v1336_v46 }
 0x1f0   :  { %1193 = vmatpush3.bf16.msra.mxu0 %v1337_v47 }
 0x1f1   :  { %1194 = vmatprep.subr.bf16.mxu0 %v1338_v48 }
 0x1f4   :  { %1195 = vmatpush3.bf16.msra.mxu0 %v1339_v49 }
 0x1f5   :  { %1196 = vmatprep.subr.bf16.mxu0 %v1340_v51 }
 0x1f8   :  { %1197 = vmatpush3.bf16.msra.mxu0 %v1341_v53  ;;  %v1402_v53 = vmov 1  }
 0x1f9   :  { %1198 = vmatprep.subr.bf16.mxu0 %v1342_v56  ;;  %v1405_v56 = vmov 14  }
 0x1fc   :  { %1199 = vmatpush3.bf16.msra.mxu0 %v1343_v57  ;;  %v1406_v57 = vmov 5  }
 0x251   :  { %v564_v60 = vpop.permute.xlu0 %563 }
 0x252   :  { %1175 = vmatmul.mubr.msk.bf16.vlgmr.msra.gmra.mrb[8].mxu1 %vm142_vm2, %v564_v60 }
 0x253   :  { %690 = vmatpush1.bf16.msra.mxu1 %v1310_v58  ;;  %721 = vmatprep.mubr.bf16.mxu1 %v1398_v22  ;;  %v1407_v58 = vmov 18  }
 0x254   :  { %691 = vmatprep.subr.bf16.mxu1 %v1315_v59  ;;  %v1408_v59 = vmov 8  }
 0x255   :  { %v462_v48 = vpop.permute.xlu0 %461 }
 0x257   :  { %692 = vmatpush1.bf16.msra.mxu1 %v1313_v61  ;;  %v1410_v61 = vmov 9  }
 0x258   :  { %730 = vmatprep.subr.bf16.mxu1 %v1318_v62  ;;  %v1411_v62 = vmov 26  }
 0x25a   :  { %1176 = vmatmul.mubr.msk.bf16.vlgmr.msra.gmra.mrb[12].mxu1 %vm142_vm2, %v564_v60 }
 0x25b   :  { %731 = vmatpush1.bf16.msra.mxu1 %v1316_v63  ;;  %762 = vmatprep.mubr.bf16.mxu1 %v1398_v22  ;;  %v1412_v63 = vmov 12  }
 0x25c   :  { %732 = vmatprep.subr.bf16.mxu1 %v1321_v1  ;;  %v1413_v1 = vmov 30  }
 0x25f   :  { %733 = vmatpush1.bf16.msra.mxu1 %v1319_v2  ;;  %v1414_v2 = vmov 13  }
 0x260   :  { %771 = vmatprep.subr.bf16.mxu1 %v1324_v3  ;;  %v1415_v3 = vmov 16  }
 0x262   :  { %1177 = vmatmul.mubr.msk.bf16.vlgmr.msra.gmra.mrb[16].mxu1 %vm142_vm2, %v564_v60 }
 0x263   :  { %772 = vmatpush1.bf16.msra.mxu1 %v1322_v4  ;;  %803 = vmatprep.mubr.bf16.mxu1 %v1398_v22  ;;  %v1416_v4 = vmov 7  }
 0x264   :  { %773 = vmatprep.subr.bf16.mxu1 %v1327_v5  ;;  %v1417_v5 = vmov 17  }
 0x267   :  { %774 = vmatpush1.bf16.msra.mxu1 %v1325_v6  ;;  %v1418_v6 = vmov 20  }
 0x26a   :  { %1178 = vmatmul.mubr.msk.bf16.vlgmr.msra.gmra.mrb[20].mxu1 %vm142_vm2, %v564_v60  ;;  %v1409_v60 = vmov 22  }
 0x2b2   :  { %v260_v14 = vpop.f32.mrb[4].mxu0 }
 0x2b3   :  { %v261_v15 = vadd.f32 %v260_v14, %v196_v12  ;;  %v262_v16 = vpop.f32.mrb[5].mxu0  ;;  %v1421_v12 = vmov 25   ;;  %v1423_v14 = vmov 29  }
 0x2b4   :  { %v263_v17 = vadd.f32 %v262_v16, %v200_v13  ;;  %v264_v18 = vpop.f32.mrb[6].mxu0  ;;  %v1422_v13 = vmov 28   ;;  %v1425_v16 = vmov 11  }
 0x2b5   :  { %v267_v19 = vand.u32 2147483647, %v261_v15  ;;  %v265_v20 = vpop.f32.mrb[7].mxu0  ;;  %v1424_v15 = vmov 3  }
 0x2b6   :  { %v268_v21 = vand.u32 2147483647, %v263_v17  ;;  %v1705_v17 = vld [vmem:[%s1835_s6 + $0x4] sm:$0xff]  ;;  %s1426_s6 = smov 32  }
 0x2b7   :  { %v328_v22 = vmul.f32 %v321_v50, %v267_v19  ;;  %v525_v18 = vrot.slane %v1705_v17, %v195_v9 }
 0x2b8   :  { %v329_v23 = vmul.f32 %v323_v52, %v268_v21  ;;  %v1401_v52 = vmov 6  }
 0x2b9   :  { %v330_v25 = vpack.c.bf16 %v328_v22, %v328_v22  ;;  %v529_v22 = vrot.slane %v1705_v17, %v199_v11 }
 0x2ba   :  { %v331_v24 = vpack.c.bf16 %v329_v23, %v329_v23 }
 0x2bc   :  { %496 = vmatprep.mubr.bf16.mxu0 %v331_v24 }
 0x2bd   :  { %497 = vmatmul.mubr.bf16.vlgmr.msra.gmra.mrb[8].mxu0 %v330_v25 }
 0x325   :  { %v1659_v27 = vpop.f32.mrb[8].mxu1 }
 0x326   :  { %v1661_v28 = vpop.f32.mrb[9].mxu1  ;;  %v683_v19 = vadd.f32 %v1659_v27, %v525_v18  ;;  %v532_v27 = vsub.s32 2, %v1648_v8 }
 0x327   :  { %v686_v29 = vpop.f32.mrb[10].mxu1  ;;  %v685_v25 = vadd.f32 %v1661_v28, %v529_v22 }
 0x328   :  { %v687_v30 = vpop.f32.mrb[11].mxu1  ;;  %v1711_v20 = vand.u32 2147483647, %v683_v19 }
 0x329   :  { %v1724_v11 = vand.u32 2147483647, %v685_v25 }
 0x32d   :  { %v1663_v31 = vpop.f32.mrb[12].mxu1 }
 0x32e   :  { %v1665_v33 = vpop.f32.mrb[13].mxu1 }
 0x32f   :  { %v727_v34 = vpop.f32.mrb[14].mxu1 }
 0x330   :  { %v728_v35 = vpop.f32.mrb[15].mxu1  ;;  %v533_v34 = vrot.slane %v1705_v17, %v532_v27 }
 0x335   :  { %v1667_v36 = vpop.f32.mrb[16].mxu1 }
 0x336   :  { %v1669_v37 = vpop.f32.mrb[17].mxu1 }
 0x337   :  { %v768_v38 = vpop.f32.mrb[18].mxu1 }
 0x338   :  { %v769_v39 = vpop.f32.mrb[19].mxu1 }
 0x339   :  { %v724_v39 = vadd.f32 %v1663_v31, %v533_v34 }
 0x33d   :  { %v1671_v40 = vpop.f32.mrb[20].mxu1 }
 0x33e   :  { %v1673_v41 = vpop.f32.mrb[21].mxu1 }
 0x33f   :  { %v809_v42 = vpop.f32.mrb[22].mxu1 }
 0x340   :  { %v810_v43 = vpop.f32.mrb[23].mxu1 }
 0x390   :  { %v1200_v44 = vpop.f32.mrb[8].mxu0 }
 0x391   :  { %v1201_v45 = vpop.f32.mrb[9].mxu0 }
 0x392   :  { %v1202_v46 = vadd.f32 %v1201_v45, %v1200_v44  ;;  %v1203_v47 = vpop.f32.mrb[10].mxu0  ;;  %v536_v44 = vsub.s32 3, %v1648_v8  ;;  %v1427_v45 = vmov 31  }
 0x393   :  { %v1204_v49 = vpop.f32.mrb[11].mxu0 }
 0x394   :  { %v499_v50 = vadd.f32 %v1202_v46, %v462_v48  ;;  %v1737_v46 = vand.u32 2147483647, %v724_v39  ;;  %v537_v48 = vrot.slane %v1705_v17, %v536_v44 }
 0x396   :  { %v1675_v51 = vmax.f32 %v499_v50, 0.0  ;;  %v726_v50 = vadd.f32 %v1665_v33, %v537_v48 }
 0x398   :  { %842 = vperm.xlu0 %1262, %v1675_v51   ;;  %822 = vperm.xlu1 %1260, %v1675_v51  }
 0x39c   :  { %1265 = vset.pattern.permute.xlu0 %v1401_v52  ;;  %1261 = vset.pattern.permute.xlu1 %v1402_v53 }
 0x39d   :  { %878 = vperm.xlu0 %1265, %v1675_v51   ;;  %832 = vperm.xlu1 %1261, %v1675_v51  }
 0x3a1   :  { %1268 = vset.pattern.permute.xlu0 %v1403_v54  ;;  %1263 = vset.pattern.permute.xlu1 %v1404_v55  ;;  %v1428_v55 = vmov 15  }
 0x3a2   :  { %914 = vperm.xlu0 %1268, %v1675_v51   ;;  %858 = vperm.xlu1 %1263, %v1675_v51  }
 0x3a6   :  { %1271 = vset.pattern.permute.xlu0 %v1405_v56  ;;  %1264 = vset.pattern.permute.xlu1 %v1406_v57  ;;  %v540_v56 = vsub.s32 4, %v1648_v8  ;;  %v1749_v57 = vand.u32 2147483647, %v726_v50 }
 0x3a7   :  { %950 = vperm.xlu0 %1271, %v1675_v51   ;;  %868 = vperm.xlu1 %1264, %v1675_v51  }
 0x3ab   :  { %1274 = vset.pattern.permute.xlu0 %v1407_v58  ;;  %1266 = vset.pattern.permute.xlu1 %v1408_v59  ;;  %v541_v59 = vrot.slane %v1705_v17, %v540_v56 }
 0x3ac   :  { %986 = vperm.xlu0 %1274, %v1675_v51   ;;  %894 = vperm.xlu1 %1266, %v1675_v51  }
 0x3b0   :  { %1277 = vset.pattern.permute.xlu0 %v1409_v60  ;;  %1267 = vset.pattern.permute.xlu1 %v1410_v61  ;;  %v765_v61 = vadd.f32 %v1667_v36, %v541_v59 }
 0x3b1   :  { %1022 = vperm.xlu0 %1277, %v1675_v51   ;;  %904 = vperm.xlu1 %1267, %v1675_v51  }
 0x3b5   :  { %1280 = vset.pattern.permute.xlu0 %v1411_v62  ;;  %1269 = vset.pattern.permute.xlu1 %v1412_v63 }
 0x3b6   :  { %1058 = vperm.xlu0 %1280, %v1675_v51   ;;  %930 = vperm.xlu1 %1269, %v1675_v51  }
 0x3ba   :  { %1283 = vset.pattern.permute.xlu0 %v1413_v1  ;;  %1270 = vset.pattern.permute.xlu1 %v1414_v2  ;;  %v1429_v2 = vmov 19  }
 0x3bb   :  { %1094 = vperm.xlu0 %1283, %v1675_v51   ;;  %940 = vperm.xlu1 %1270, %v1675_v51  }
 0x3bf   :  { %1272 = vset.pattern.permute.xlu1 %v1415_v3  ;;  %1285 = vset.pattern.permute.xlu0 %v1416_v4  ;;  %v544_v3 = vsub.s32 5, %v1648_v8  ;;  %v1761_v4 = vand.u32 2147483647, %v765_v61 }
 0x3c0   :  { %966 = vperm.xlu1 %1272, %v1675_v51  }
 0x3c4   :  { %1273 = vset.pattern.permute.xlu1 %v1417_v5 }
 0x3c5   :  { %976 = vperm.xlu1 %1273, %v1675_v51  }
 0x3c9   :  { %1275 = vset.pattern.permute.xlu1 %v1418_v6  ;;  %v545_v6 = vrot.slane %v1705_v17, %v544_v3 }
 0x3ca   :  { %1002 = vperm.xlu1 %1275, %v1675_v51  }
 0x3ce   :  { %1276 = vset.pattern.permute.xlu1 %v1419_v7 }
 0x3cf   :  { %1012 = vperm.xlu1 %1276, %v1675_v51  }
 0x3d3   :  { %1278 = vset.pattern.permute.xlu1 %v1420_v10  ;;  %v767_v10 = vadd.f32 %v1669_v37, %v545_v6 }
 0x3d4   :  { %1038 = vperm.xlu1 %1278, %v1675_v51  }
 0x3d5   :  { %v1773_v18 = vand.u32 2147483647, %v767_v10 }
 0x3d8   :  { %1279 = vset.pattern.permute.xlu1 %v1421_v12 }
 0x3d9   :  { %1048 = vperm.xlu1 %1279, %v1675_v51  }
 0x3dd   :  { %1281 = vset.pattern.permute.xlu1 %v1422_v13 }
 0x3de   :  { %1074 = vperm.xlu1 %1281, %v1675_v51  }
 0x3e2   :  { %1282 = vset.pattern.permute.xlu1 %v1423_v14 }
 0x3e3   :  { %1084 = vperm.xlu1 %1282, %v1675_v51  }
 0x3e7   :  { %1284 = vset.pattern.permute.xlu1 %v1424_v15  ;;  %v1430_v15 = vmov 23  }
 0x3e8   :  { %852 = vperm.xlu1 %1284, %v1675_v51  }
 0x3ec   :  { %1286 = vset.pattern.permute.xlu1 %v1425_v16  ;;  %v548_v16 = vsub.s32 6, %v1648_v8 }
 0x417   :  { %v823_v21 = vpop.permute.xlu1 %822  ;;  %v843_v24 = vpop.permute.xlu0 %842 }
 0x418   :  { %v825_v23 = vmul.f32 %v823_v21, %v1711_v20  ;;  %v845_v26 = vmul.f32 %v843_v24, %v1711_v20  ;;  %v549_v21 = vrot.slane %v1705_v17, %v548_v16 }
 0x41a   :  { %827 = vrot.lane.b32.xlu1 %v825_v23, %s1399_s29  ;;  %v806_v23 = vadd.f32 %v1671_v40, %v549_v21 }
 0x41c   :  { %v833_v29 = vpop.permute.xlu1 %832  ;;  %v879_v35 = vpop.permute.xlu0 %878  ;;  %v1785_v27 = vand.u32 2147483647, %v806_v23 }
 0x41d   :  { %v835_v9 = vmul.f32 %v833_v29, %v1711_v20  ;;  %v881_v38 = vmul.f32 %v879_v35, %v1724_v11  ;;  %v1431_v29 = vmov 27  }
 0x41e   :  { %847 = vrot.lane.b32.xlu1 %v845_v26, %s1426_s6 }
 0x41f   :  { %837 = vrot.lane.b32.xlu0 %v835_v9, %s1393_s11  ;;  %v552_v9 = vsub.s32 7, %v1648_v8 }
 0x421   :  { %v859_v30 = vpop.permute.xlu1 %858  ;;  %v915_v31 = vpop.permute.xlu0 %914  ;;  %v553_v34 = vrot.slane %v1705_v17, %v552_v9 }
 0x422   :  { %v861_v28 = vmul.f32 %v859_v30, %v1724_v11  ;;  %v917_v52 = vmul.f32 %v915_v31, %v1737_v46 }
 0x423   :  { %888 = vperm.xlu0 %1285, %v1675_v51  }
 0x424   :  { %863 = vrot.lane.b32.xlu1 %v861_v28, %s1399_s29  ;;  %v808_v28 = vadd.f32 %v1673_v41, %v553_v34 }
 0x426   :  { %v869_v42 = vpop.permute.xlu1 %868  ;;  %v951_v60 = vpop.permute.xlu0 %950  ;;  %v1797_v17 = vand.u32 2147483647, %v808_v28 }
 0x427   :  { %v871_v43 = vmul.f32 %v869_v42, %v1724_v11  ;;  %883 = vrot.lane.b32.xlu0 %v881_v38, %s1426_s6  ;;  %v953_v62 = vmul.f32 %v951_v60, %v1749_v57 }
 0x428   :  { %1292 = vset.pattern.permute.xlu0 %v1427_v45 }
 0x429   :  { %873 = vrot.lane.b32.xlu1 %v871_v43, %s1393_s11 }
 0x42b   :  { %v895_v47 = vpop.permute.xlu1 %894  ;;  %v987_v7 = vpop.permute.xlu0 %986 }
 0x42c   :  { %v897_v49 = vmul.f32 %v895_v47, %v1737_v46  ;;  %v989_v12 = vmul.f32 %v987_v7, %v1761_v4 }
 0x42d   :  { %924 = vperm.xlu1 %1286, %v1675_v51  }
 0x42e   :  { %899 = vrot.lane.b32.xlu0 %v897_v49, %s1399_s29 }
 0x430   :  { %v905_v53 = vpop.permute.xlu1 %904  ;;  %v1023_v22 = vpop.permute.xlu0 %1022 }
 0x431   :  { %v907_v54 = vmul.f32 %v905_v53, %v1737_v46  ;;  %1287 = vset.pattern.permute.xlu1 %v1428_v55  ;;  %v1025_v24 = vmul.f32 %v1023_v22, %v1773_v18 }
 0x432   :  { %919 = vrot.lane.b32.xlu0 %v917_v52, %s1426_s6 }
 0x433   :  { %909 = vrot.lane.b32.xlu1 %v907_v54, %s1393_s11 }
 0x435   :  { %v931_v58 = vpop.permute.xlu1 %930  ;;  %v1059_v35 = vpop.permute.xlu0 %1058 }
 0x436   :  { %v933_v33 = vmul.f32 %v931_v58, %v1749_v57  ;;  %v1061_v8 = vmul.f32 %v1059_v35, %v1785_v27 }
 0x437   :  { %960 = vperm.xlu1 %1287, %v1675_v51  }
 0x438   :  { %935 = vrot.lane.b32.xlu0 %v933_v33, %s1399_s29 }
 0x43a   :  { %v941_v63 = vpop.permute.xlu1 %940  ;;  %v1095_v44 = vpop.permute.xlu0 %1094 }
 0x43b   :  { %v943_v1 = vmul.f32 %v941_v63, %v1749_v57  ;;  %1288 = vset.pattern.permute.xlu1 %v1429_v2  ;;  %v1097_v41 = vmul.f32 %v1095_v44, %v1797_v17 }
 0x43c   :  { %955 = vrot.lane.b32.xlu0 %v953_v62, %s1426_s6 }
 0x43d   :  { %945 = vrot.lane.b32.xlu1 %v943_v1, %s1393_s11 }
 0x43f   :  { %v967_v5 = vpop.permute.xlu1 %966 }
 0x440   :  { %v969_v36 = vmul.f32 %v967_v5, %v1761_v4 }
 0x441   :  { %996 = vperm.xlu1 %1288, %v1675_v51  }
 0x442   :  { %971 = vrot.lane.b32.xlu0 %v969_v36, %s1399_s29 }
 0x444   :  { %v977_v13 = vpop.permute.xlu1 %976 }
 0x445   :  { %v979_v14 = vmul.f32 %v977_v13, %v1761_v4  ;;  %1289 = vset.pattern.permute.xlu1 %v1430_v15 }
 0x446   :  { %991 = vrot.lane.b32.xlu0 %v989_v12, %s1426_s6 }
 0x447   :  { %981 = vrot.lane.b32.xlu1 %v979_v14, %s1393_s11 }
 0x449   :  { %v1003_v19 = vpop.permute.xlu1 %1002 }
 0x44a   :  { %v1005_v37 = vmul.f32 %v1003_v19, %v1773_v18 }
 0x44b   :  { %1032 = vperm.xlu1 %1289, %v1675_v51  }
 0x44c   :  { %1007 = vrot.lane.b32.xlu0 %v1005_v37, %s1399_s29 }
 0x44e   :  { %v1013_v25 = vpop.permute.xlu1 %1012 }
 0x44f   :  { %v1015_v26 = vmul.f32 %v1013_v25, %v1773_v18  ;;  %1290 = vset.pattern.permute.xlu1 %v1431_v29 }
 0x450   :  { %1027 = vrot.lane.b32.xlu0 %v1025_v24, %s1426_s6 }
 0x451   :  { %1017 = vrot.lane.b32.xlu1 %v1015_v26, %s1393_s11 }
 0x453   :  { %v1039_v30 = vpop.permute.xlu1 %1038 }
 0x454   :  { %v1041_v40 = vmul.f32 %v1039_v30, %v1785_v27 }
 0x455   :  { %1068 = vperm.xlu1 %1290, %v1675_v51  }
 0x456   :  { %1043 = vrot.lane.b32.xlu0 %v1041_v40, %s1399_s29 }
 0x458   :  { %v1049_v38 = vpop.permute.xlu1 %1048 }
 0x459   :  { %v1051_v39 = vmul.f32 %v1049_v38, %v1785_v27  ;;  %1291 = vset.pattern.permute.xlu1 %v1427_v45 }
 0x45a   :  { %1063 = vrot.lane.b32.xlu0 %v1061_v8, %s1426_s6 }
 0x45b   :  { %1053 = vrot.lane.b32.xlu1 %v1051_v39, %s1393_s11 }
 0x45d   :  { %v1075_v42 = vpop.permute.xlu1 %1074 }
 0x45e   :  { %v1077_v43 = vmul.f32 %v1075_v42, %v1797_v17 }
 0x45f   :  { %1104 = vperm.xlu1 %1291, %v1675_v51  }
 0x460   :  { %1079 = vrot.lane.b32.xlu0 %v1077_v43, %s1399_s29 }
 0x462   :  { %v1085_v47 = vpop.permute.xlu1 %1084 }
 0x463   :  { %v1087_v48 = vmul.f32 %v1085_v47, %v1797_v17 }
 0x464   :  { %1099 = vrot.lane.b32.xlu0 %v1097_v41, %s1426_s6 }
 0x465   :  { %1089 = vrot.lane.b32.xlu1 %v1087_v48, %s1393_s11 }
 0x467   :  { %v853_v45 = vpop.permute.xlu1 %852 }
 0x468   :  { %1114 = vrot.lane.b32.xlu0 %v1675_v51, %s1426_s6  ;;  %v855_v56 = vmul.f32 %v853_v45, %v1711_v20 }
 0x48c   :  { %v828_v49 = vpop.permute.xlu1 %827 }
 0x48d   :  { %v830_v50 = vadd.f32 %v828_v49, %v1553_v32 }
 0x490   :  { %v848_v53 = vpop.permute.xlu1 %847 }
 0x491   :  { %v838_v31 = vpop.permute.xlu0 %837 }
 0x492   :  { %v840_v52 = vadd.f32 %v838_v31, %v830_v50 }
 0x494   :  { %v850_v54 = vadd.f32 %v848_v53, %v840_v52 }
 0x496   :  { %v864_v55 = vpop.permute.xlu1 %863  ;;  %v856_v58 = vadd.f32 %v855_v56, %v850_v54 }
 0x498   :  { %v866_v60 = vadd.f32 %v864_v55, %v856_v58 }
 0x49b   :  { %v874_v59 = vpop.permute.xlu1 %873 }
 0x49c   :  { %v876_v61 = vadd.f32 %v874_v59, %v866_v60 }
 0x4a2   :  { %v889_v33 = vpop.permute.xlu0 %888 }
 0x4a3   :  { %v891_v51 = vmul.f32 %v889_v33, %v1724_v11 }
 0x4a6   :  { %v884_v62 = vpop.permute.xlu0 %883 }
 0x4a7   :  { %v886_v63 = vadd.f32 %v884_v62, %v876_v61 }
 0x4a9   :  { %v892_v2 = vadd.f32 %v891_v51, %v886_v63 }
 0x4aa   :  { %v900_v1 = vpop.permute.xlu0 %899 }
 0x4ab   :  { %v902_v32 = vadd.f32 %v900_v1, %v892_v2 }
 0x4ac   :  { %v925_v3 = vpop.permute.xlu1 %924 }
 0x4ad   :  { %v927_v10 = vmul.f32 %v925_v3, %v1737_v46 }
 0x4ae   :  { %v920_v5 = vpop.permute.xlu0 %919 }
 0x4b0   :  { %v910_v6 = vpop.permute.xlu1 %909 }
 0x4b1   :  { %v912_v36 = vadd.f32 %v910_v6, %v902_v32 }
 0x4b2   :  { %v936_v7 = vpop.permute.xlu0 %935 }
 0x4b3   :  { %v922_v20 = vadd.f32 %v920_v5, %v912_v36 }
 0x4b5   :  { %v928_v12 = vadd.f32 %v927_v10, %v922_v20 }
 0x4b6   :  { %v956_v13 = vpop.permute.xlu0 %955  ;;  %v961_v14 = vpop.permute.xlu1 %960 }
 0x4b7   :  { %v938_v15 = vadd.f32 %v936_v7, %v928_v12  ;;  %v963_v11 = vmul.f32 %v961_v14, %v1749_v57 }
 0x4ba   :  { %v972_v16 = vpop.permute.xlu0 %971  ;;  %v946_v19 = vpop.permute.xlu1 %945 }
 0x4bb   :  { %v948_v21 = vadd.f32 %v946_v19, %v938_v15 }
 0x4bd   :  { %v958_v37 = vadd.f32 %v956_v13, %v948_v21 }
 0x4be   :  { %v992_v23 = vpop.permute.xlu0 %991 }
 0x4bf   :  { %v964_v22 = vadd.f32 %v963_v11, %v958_v37 }
 0x4c0   :  { %v997_v24 = vpop.permute.xlu1 %996 }
 0x4c1   :  { %v974_v25 = vadd.f32 %v972_v16, %v964_v22  ;;  %v999_v46 = vmul.f32 %v997_v24, %v1761_v4 }
 0x4c2   :  { %v1008_v9 = vpop.permute.xlu0 %1007 }
 0x4c4   :  { %v982_v26 = vpop.permute.xlu1 %981 }
 0x4c5   :  { %v984_v29 = vadd.f32 %v982_v26, %v974_v25 }
 0x4c6   :  { %v1028_v35 = vpop.permute.xlu0 %1027 }
 0x4c7   :  { %v994_v30 = vadd.f32 %v992_v23, %v984_v29 }
 0x4c9   :  { %v1000_v34 = vadd.f32 %v999_v46, %v994_v30 }
 0x4ca   :  { %v1033_v40 = vpop.permute.xlu1 %1032  ;;  %v1044_v42 = vpop.permute.xlu0 %1043 }
 0x4cb   :  { %v1010_v28 = vadd.f32 %v1008_v9, %v1000_v34  ;;  %v1035_v39 = vmul.f32 %v1033_v40, %v1773_v18 }
 0x4ce   :  { %v1018_v8 = vpop.permute.xlu1 %1017  ;;  %v1064_v47 = vpop.permute.xlu0 %1063 }
 0x4cf   :  { %v1020_v38 = vadd.f32 %v1018_v8, %v1010_v28 }
 0x4d1   :  { %v1030_v57 = vadd.f32 %v1028_v35, %v1020_v38 }
 0x4d2   :  { %v1080_v50 = vpop.permute.xlu0 %1079 }
 0x4d3   :  { %v1036_v43 = vadd.f32 %v1035_v39, %v1030_v57 }
 0x4d4   :  { %v1069_v44 = vpop.permute.xlu1 %1068 }
 0x4d5   :  { %v1046_v41 = vadd.f32 %v1044_v42, %v1036_v43  ;;  %v1071_v49 = vmul.f32 %v1069_v44, %v1785_v27 }
 0x4d6   :  { %v1100_v56 = vpop.permute.xlu0 %1099 }
 0x4d8   :  { %v1054_v48 = vpop.permute.xlu1 %1053 }
 0x4d9   :  { %v1056_v45 = vadd.f32 %v1054_v48, %v1046_v41 }
 0x4da   :  { %v1115_v60 = vpop.permute.xlu0 %1114 }
 0x4db   :  { %v1066_v4 = vadd.f32 %v1064_v47, %v1056_v45 }
 0x4dd   :  { %v1072_v31 = vadd.f32 %v1071_v49, %v1066_v4 }
 0x4de   :  { %v1105_v52 = vpop.permute.xlu1 %1104 }
 0x4df   :  { %v1082_v53 = vadd.f32 %v1080_v50, %v1072_v31  ;;  %v1107_v18 = vmul.f32 %v1105_v52, %v1797_v17 }
 0x4e2   :  { %v1090_v54 = vpop.permute.xlu1 %1089 }
 0x4e3   :  { %v1092_v55 = vadd.f32 %v1090_v54, %v1082_v53 }
 0x4e5   :  { %v1102_v58 = vadd.f32 %v1100_v56, %v1092_v55 }
 0x4e7   :  { %v1108_v59 = vadd.f32 %v1107_v18, %v1102_v58 }
 0x4e9   :  { %1110 = vrot.lane.b32.xlu1 %v1108_v59, %s1426_s6 }
 0x55b   :  { %v1111_v33 = vpop.permute.xlu1 %1110 }
 0x55c   :  { %1113 = vst.msk [vmem:[%s1836_s7] sm:$0xff] %vm142_vm2, %v1111_v33 }
 0x55d   :  { %1118 = vst.msk [vmem:[%s1836_s7] sm:$0xff] %vm1117_vm5, %v1115_v60 }
 0x55e   :  { %1120 = vst.msk [vmem:[%s1836_s7] sm:$0xff] %vm1119_vm6, %v1396_v0 }
 0x55f   :  { %1125 = vsyncpa [#allocation3], 1 }
 0x560   :  { %1126 = vsyncpa [#allocation5], 1 }

</bundles_post_ra>
